<compile_context>
chip_gen: v7x
topology: tpu7x:2x2x1
jax: 0.10.0
libtpu: 0.0.40
codegen_flags: <defaults>
</compile_context>

<pallas_src>
import jax
import jax.numpy as jnp
from jax.experimental import pallas as pl
from jax.experimental.pallas import tpu as pltpu


def _round_up(n, m):
    return ((n + m - 1) // m) * m


def mlp_kernel(x_ref, w1_ref, b1_ref, w2_ref, b2_ref, w3_ref, b3_ref, o_ref):
    # Feature-major: x tile is (20, TILE_B); batch on lanes, features on sublanes.
    x = x_ref[...].astype(jnp.bfloat16)                                   # (20, TB)

    h1 = jnp.dot(w1_ref[...], x, preferred_element_type=jnp.float32)      # (64, TB) f32
    h1 = jnp.maximum(h1 + b1_ref[...], 0.0)

    h2 = jnp.dot(w2_ref[...], h1.astype(jnp.bfloat16),
                 preferred_element_type=jnp.float32)                      # (32, TB) f32
    h2 = jnp.maximum(h2 + b2_ref[...], 0.0)

    # Final Linear(32, 1): an N=1 MXU matmul wastes 127/128 output lanes, so use
    # a VPU broadcast-multiply + sublane (XLU) reduction instead.
    out = jnp.sum(h2 * w3_ref[...], axis=0, keepdims=True) + b3_ref[0, 0]  # (1, TB)
    o_ref[...] = out


def trading_model_forward(x, params, *, tile_b=2048):
    """x: (B, 20) float32 -> (B, 1) float32 (matches the PyTorch module)."""
    w1, b1, w2, b2, w3, b3 = params  # kernel layout, see init_params()
    B = x.shape[0]

    # Batch tile: big enough to amortize per-grid-step overhead, capped so tiny
    # batches don't pad to thousands of rows. Always a multiple of 128 (lanes).
    tb = min(int(tile_b), _round_up(max(B, 1), 128))
    b_pad = _round_up(B, tb)

    # Feature-major activations, zero-padded batch tail (padded rows discarded).
    x_t = jnp.pad(x.astype(jnp.float32).T, ((0, 0), (0, b_pad - B)))       # (20, B_pad)

    # bf16 MXU operands (accumulation stays f32 inside the kernel).
    w1b = w1.astype(jnp.bfloat16)
    w2b = w2.astype(jnp.bfloat16)

    resident = lambda i: (0, 0)  # constant block index => stays resident in VMEM

    out = pl.pallas_call(
        mlp_kernel,
        out_shape=jax.ShapeDtypeStruct((1, b_pad), jnp.float32),
        grid=(b_pad // tb,),
        in_specs=[
            pl.BlockSpec((20, tb), lambda i: (0, i)),                 # x tile (pipelined)
            pl.BlockSpec((64, 20), resident),                         # w1 (bf16)
            pl.BlockSpec((64, 1), resident),                          # b1
            pl.BlockSpec((32, 64), resident),                         # w2 (bf16)
            pl.BlockSpec((32, 1), resident),                          # b2
            pl.BlockSpec((32, 1), resident),                          # w3 column
            pl.BlockSpec(memory_space=pltpu.MemorySpace.SMEM),        # b3 scalar
        ],
        out_specs=pl.BlockSpec((1, tb), lambda i: (0, i)),            # lane-dense output
        compiler_params=pltpu.CompilerParams(
            dimension_semantics=("parallel",),                        # v7x: both TCs
        ),
    )(x_t, w1b, b1, w2b, b2, w3, b3)

    # (1, B_pad) -> (B, 1), dropping padded rows.
    return out[0, :B][:, None]


def init_params(key):
    """Deterministic synthetic init (PyTorch-like uniform bounds), kernel layout:
       weights (out, in) like nn.Linear.weight, biases as (out, 1) columns,
       final weight as a (32, 1) column, final bias as a (1, 1) SMEM scalar."""
    def linear(key, fan_in, fan_out):
        k_w, k_b = jax.random.split(key)
        bound = 1.0 / jnp.sqrt(fan_in)
        w = jax.random.uniform(k_w, (fan_out, fan_in), jnp.float32, -bound, bound)
        b = jax.random.uniform(k_b, (fan_out,), jnp.float32, -bound, bound)
        return w, b

    k1, k2, k3 = jax.random.split(key, 3)
    w1, b1 = linear(k1, 20, 64)
    w2, b2 = linear(k2, 64, 32)
    w3, b3 = linear(k3, 32, 1)
    return (w1, b1[:, None], w2, b2[:, None], w3.T, b3[None, :])


if __name__ == "__main__":
    key = jax.random.PRNGKey(0)
    k_params, k_x = jax.random.split(key)

    params = init_params(k_params)
    x = jax.random.normal(k_x, (8, 20), jnp.float32)  # batch=8, features=20

    out = jax.block_until_ready(trading_model_forward(x, params))

    # reference check in plain JAX (f32; kernel uses bf16 MXU operands, hence
    # the relaxed tolerance)
    w1, b1, w2, b2, w3, b3 = params
    ref = jnp.maximum(x @ w1.T + b1[:, 0], 0.0)
    ref = jnp.maximum(ref @ w2.T + b2[:, 0], 0.0)
    ref = ref @ w3 + b3

    assert out.shape == (8, 1)
    assert jnp.allclose(out, ref, atol=2e-2, rtol=2e-2)

    print("KERNEL_OK")
</pallas_src>

<mosaic_0001>
module attributes {stable_mosaic.version = 11 : i64} {
  func.func @mlp_kernel(%arg0: i32, %arg1: memref<20x128xf32, #tpu.memory_space<vmem>>, %arg2: memref<64x20xbf16, #tpu.memory_space<vmem>>, %arg3: memref<64x1xf32, #tpu.memory_space<vmem>>, %arg4: memref<32x64xbf16, #tpu.memory_space<vmem>>, %arg5: memref<32x1xf32, #tpu.memory_space<vmem>>, %arg6: memref<32x1xf32, #tpu.memory_space<vmem>>, %arg7: memref<1x1xf32, #tpu.memory_space<smem>>, %arg8: memref<1x128xf32, #tpu.memory_space<vmem>>) attributes {dimension_semantics = [#tpu.dimension_semantics<parallel>], iteration_bounds = array<i64: 1>, scalar_prefetch = 0 : i64, scratch_operands = 0 : i64, tpu.core_type = #tpu.core_type<tc>, window_params = [{transform_indices = @transform_0, window_bounds = array<i64: 20, 128>}, {pipeline_mode = #tpu.pipeline_mode<synchronous>, transform_indices = @transform_1, window_bounds = array<i64: 64, 20>}, {pipeline_mode = #tpu.pipeline_mode<synchronous>, transform_indices = @transform_2, window_bounds = array<i64: 64, 1>}, {pipeline_mode = #tpu.pipeline_mode<synchronous>, transform_indices = @transform_3, window_bounds = array<i64: 32, 64>}, {pipeline_mode = #tpu.pipeline_mode<synchronous>, transform_indices = @transform_4, window_bounds = array<i64: 32, 1>}, {pipeline_mode = #tpu.pipeline_mode<synchronous>, transform_indices = @transform_5, window_bounds = array<i64: 32, 1>}, {transform_indices = @transform_6, window_bounds = array<i64: 1, 1>}, {transform_indices = @transform_7, window_bounds = array<i64: 1, 128>}]} {
    %c0 = arith.constant 0 : index
    %c0_0 = arith.constant 0 : index
    %0 = vector.load %arg1[%c0, %c0_0] : memref<20x128xf32, #tpu.memory_space<vmem>>, vector<20x128xf32>
    %1 = arith.truncf %0 : vector<20x128xf32> to vector<20x128xbf16>
    %c0_1 = arith.constant 0 : index
    %c0_2 = arith.constant 0 : index
    %2 = vector.load %arg2[%c0_1, %c0_2] : memref<64x20xbf16, #tpu.memory_space<vmem>>, vector<64x20xbf16>
    %cst = arith.constant dense<0.000000e+00> : vector<64x128xf32>
    %3 = tpu.matmul %2, %1, %cst {dimension_numbers = #tpu.dot_dimension_numbers<[1], [0], [0], [1], [0, 0, 1, 1], [], []>} : vector<64x20xbf16>, vector<20x128xbf16>, vector<64x128xf32> -> vector<64x128xf32>
    %c0_3 = arith.constant 0 : index
    %c0_4 = arith.constant 0 : index
    %4 = vector.load %arg3[%c0_3, %c0_4] : memref<64x1xf32, #tpu.memory_space<vmem>>, vector<64x1xf32>
    %5 = vector.broadcast %4 : vector<64x1xf32> to vector<64x128xf32>
    %6 = arith.addf %3, %5 : vector<64x128xf32>
    %cst_5 = arith.constant 0.000000e+00 : f32
    %7 = vector.broadcast %cst_5 : f32 to vector<64x128xf32>
    %8 = arith.maximumf %6, %7 : vector<64x128xf32>
    %c0_6 = arith.constant 0 : index
    %c0_7 = arith.constant 0 : index
    %9 = vector.load %arg4[%c0_6, %c0_7] : memref<32x64xbf16, #tpu.memory_space<vmem>>, vector<32x64xbf16>
    %10 = arith.truncf %8 : vector<64x128xf32> to vector<64x128xbf16>
    %cst_8 = arith.constant dense<0.000000e+00> : vector<32x128xf32>
    %11 = tpu.matmul %9, %10, %cst_8 {dimension_numbers = #tpu.dot_dimension_numbers<[1], [0], [0], [1], [0, 0, 1, 1], [], []>} : vector<32x64xbf16>, vector<64x128xbf16>, vector<32x128xf32> -> vector<32x128xf32>
    %c0_9 = arith.constant 0 : index
    %c0_10 = arith.constant 0 : index
    %12 = vector.load %arg5[%c0_9, %c0_10] : memref<32x1xf32, #tpu.memory_space<vmem>>, vector<32x1xf32>
    %13 = vector.broadcast %12 : vector<32x1xf32> to vector<32x128xf32>
    %14 = arith.addf %11, %13 : vector<32x128xf32>
    %cst_11 = arith.constant 0.000000e+00 : f32
    %15 = vector.broadcast %cst_11 : f32 to vector<32x128xf32>
    %16 = arith.maximumf %14, %15 : vector<32x128xf32>
    %c0_12 = arith.constant 0 : index
    %c0_13 = arith.constant 0 : index
    %17 = vector.load %arg6[%c0_12, %c0_13] : memref<32x1xf32, #tpu.memory_space<vmem>>, vector<32x1xf32>
    %18 = vector.broadcast %17 : vector<32x1xf32> to vector<32x128xf32>
    %19 = arith.mulf %16, %18 : vector<32x128xf32>
    %cst_14 = arith.constant dense<0.000000e+00> : vector<128xf32>
    %20 = vector.multi_reduction <add>, %19, %cst_14 [0] : vector<32x128xf32> to vector<128xf32>
    %21 = vector.shape_cast %20 : vector<128xf32> to vector<1x128xf32>
    %c0_15 = arith.constant 0 : index
    %c0_16 = arith.constant 0 : index
    %22 = memref.load %arg7[%c0_15, %c0_16] : memref<1x1xf32, #tpu.memory_space<smem>>
    %23 = vector.broadcast %22 : f32 to vector<1x128xf32>
    %24 = arith.addf %21, %23 : vector<1x128xf32>
    %c0_17 = arith.constant 0 : index
    %c0_18 = arith.constant 0 : index
    %25 = vector.load %arg8[%c0_17, %c0_18] : memref<1x128xf32, #tpu.memory_space<vmem>>, vector<1x128xf32>
    tpu.vector_store %arg8[%c0_17, %c0_18], %24 {strides = array<i32>} : memref<1x128xf32, #tpu.memory_space<vmem>>, vector<1x128xf32>,
    return
  }
  func.func @transform_0(%arg0: i32) -> (i32, i32) {
    %c0_i32 = arith.constant 0 : i32
    %c0_i32_0 = arith.constant 0 : i32
    return %c0_i32, %arg0 : i32, i32
  }
  func.func @transform_1(%arg0: i32) -> (i32, i32) {
    %c0_i32 = arith.constant 0 : i32
    %c0_i32_0 = arith.constant 0 : i32
    %c0_i32_1 = arith.constant 0 : i32
    return %c0_i32, %c0_i32_0 : i32, i32
  }
  func.func @transform_2(%arg0: i32) -> (i32, i32) {
    %c0_i32 = arith.constant 0 : i32
    %c0_i32_0 = arith.constant 0 : i32
    %c0_i32_1 = arith.constant 0 : i32
    return %c0_i32, %c0_i32_0 : i32, i32
  }
  func.func @transform_3(%arg0: i32) -> (i32, i32) {
    %c0_i32 = arith.constant 0 : i32
    %c0_i32_0 = arith.constant 0 : i32
    %c0_i32_1 = arith.constant 0 : i32
    return %c0_i32, %c0_i32_0 : i32, i32
  }
  func.func @transform_4(%arg0: i32) -> (i32, i32) {
    %c0_i32 = arith.constant 0 : i32
    %c0_i32_0 = arith.constant 0 : i32
    %c0_i32_1 = arith.constant 0 : i32
    return %c0_i32, %c0_i32_0 : i32, i32
  }
  func.func @transform_5(%arg0: i32) -> (i32, i32) {
    %c0_i32 = arith.constant 0 : i32
    %c0_i32_0 = arith.constant 0 : i32
    %c0_i32_1 = arith.constant 0 : i32
    return %c0_i32, %c0_i32_0 : i32, i32
  }
  func.func @transform_6(%arg0: i32) -> (i32, i32) {
    %c0_i32 = arith.constant 0 : i32
    %c0_i32_0 = arith.constant 0 : i32
    %c0_i32_1 = arith.constant 0 : i32
    return %c0_i32, %c0_i32_0 : i32, i32
  }
  func.func @transform_7(%arg0: i32) -> (i32, i32) {
    %c0_i32 = arith.constant 0 : i32
    %c0_i32_0 = arith.constant 0 : i32
    return %c0_i32, %arg0 : i32, i32
  }
}

</mosaic_0001>

<bundles_post_ra>
// kernel: tpu_custom_call.1
= control target key start
LH: loop header
LB: loop body
LE: loop exit
PB: predicated region body
PF: predicated region fallthrough
CT: control target
= control target key end

     0   :  { %vm110_vm0 = vcmask 162816   ;;  %vm123_vm1 = vcmask 1041408   ;;  %v440_v6 = vmov 0   ;;  %s578_s0 = inlined_call_operand.vmem [shape: f32[20,128], index: 0, kind: input, shape index: {}]   ;;  %s579_s1 = inlined_call_operand.vmem [shape: bf16[64,20], index: 1, kind: input, shape index: {}]   ;;  %s580_s2 = inlined_call_operand.vmem [shape: f32[64,1], index: 2, kind: input, shape index: {}]   ;;  %s581_s3 = inlined_call_operand.vmem [shape: bf16[32,64], index: 3, kind: input, shape index: {}]   ;;  %s582_s4 = inlined_call_operand.vmem [shape: f32[32,1], index: 4, kind: input, shape index: {}]   ;;  %s583_s5 = inlined_call_operand.vmem [shape: f32[32,1], index: 5, kind: input, shape index: {}]   ;;  %s584_s6 = inlined_call_operand.<no memory space> [shape: f32[1,1], index: 6, kind: input, shape index: {}]   ;;  %s585_s7 = inlined_call_operand.hbm [shape: f32[1,128], index: 7, kind: output, shape index: {}]  }
   0x1   :  { %v29_v0 = vld [vmem:[%s578_s0] sm:$0xff]  ;;  %v30_v1 = vld [vmem:[%s578_s0 + $0x8] sm:$0xff]  ;;  %v31_v2 = vld [vmem:[%s578_s0 + $0x10] sm:$0xf]  ;;  %408 = vset.pattern.permute.xlu0 %v440_v6  ;;  %409 = vset.pattern.permute.xlu1 %v440_v6 }
   0x2   :  { %v32_v3 = vpack.c.bf16 %v30_v1, %v29_v0  ;;  %v33_v4 = vpack.c.bf16 %v31_v2, %v31_v2  ;;  %v410_v5 = vld [vmem:[%s579_s1] sm:$0xff]   ;;  %v44_v9 = vld [vmem:[%s580_s2 + $0x10] sm:$0xff]  ;;  %v411_v10 = vld [vmem:[%s579_s1 + $0x8] sm:$0xff]  }
   0x3   :  { %385 = vmatprep.mubr.msk.bf16.mxu0 %vm110_vm0, %v410_v5  ;;  %v42_v8 = vld [vmem:[%s580_s2] sm:$0xff]  ;;  %62 = vperm.xlu1 %409, %v44_v9   ;;  %v43_v11 = vld [vmem:[%s580_s2 + $0x8] sm:$0xff]  ;;  %v45_v12 = vld [vmem:[%s580_s2 + $0x18] sm:$0xff] }
   0x4   :  { %381 = vmatprep.subr.bf16.mxu0 %v32_v3  ;;  %v125_v7 = vsel %vm123_vm1, %v33_v4, 0  ;;  %52 = vperm.xlu0 %408, %v42_v8   ;;  %v412_v13 = vld [vmem:[%s579_s1 + $0x10] sm:$0xff]   ;;  %v46_v14 = vld [vmem:[%s580_s2 + $0x20] sm:$0xff]  ;;  %v47_v15 = vld [vmem:[%s580_s2 + $0x28] sm:$0xff] }
   0x5   :  { %382 = vmatpush3.bf16.msra.mxu0 %v32_v3 }
   0x6   :  { %405 = vmatprep.subr.msk.bf16.mxu0 %vm123_vm1, %v33_v4 }
   0x7   :  { %67 = vperm.xlu1 %409, %v45_v12  }
   0x8   :  { %57 = vperm.xlu0 %408, %v43_v11  }
   0x9   :  { %384 = vmatpush3.bf16.msra.mxu0 %v125_v7 }
   0xc   :  { %386 = vmatmul.mubr.msk.bf16.vlgmr.msra.gmra.mrb[0].mxu0 %vm110_vm0, %v411_v10 }
   0xd   :  { %13 = vsyncpa [#allocation4], 0  ;;  %389 = vmatprep.mubr.msk.bf16.mxu0 %vm110_vm0, %v412_v13  ;;  %72 = vperm.xlu0 %408, %v46_v14   ;;  %v413_v16 = vld [vmem:[%s579_s1 + $0x18] sm:$0xff]   ;;  %v48_v17 = vld [vmem:[%s580_s2 + $0x30] sm:$0xff]  ;;  %vm242_vm2 = vcmask 523264   ;;  %s441_s23 = smov [#allocation3]  }
   0xe   :  { %77 = vperm.xlu1 %409, %v47_v15   ;;  %v49_v18 = vld [vmem:[%s580_s2 + $0x38] sm:$0xff]  ;;  %v208_v19 = vld [vmem:[%s582_s4] sm:$0xff]  ;;  %v209_v20 = vld [vmem:[%s582_s4 + $0x8] sm:$0xff]  ;;  %s349_s24 = sshll.u32 %s441_s23, 4  ;;  %s350_s24 = int_to_ptr.vmem [resolvable:$true] %s349_s24 }
   0xf   :  { %v210_v21 = vld [vmem:[%s582_s4 + $0x10] sm:$0xff]  ;;  %v211_v22 = vld [vmem:[%s582_s4 + $0x18] sm:$0xff]  ;;  %v302_v23 = vld [vmem:[%s583_s5] sm:$0xff]  ;;  %s416_s25 = scalar_lea.vmem %s350_s24, 16  ;;  %s420_s26 = scalar_lea.vmem %s350_s24, 32 }
  0x10   :  { %v303_v24 = vld [vmem:[%s583_s5 + $0x8] sm:$0xff]  ;;  %v304_v25 = vld [vmem:[%s583_s5 + $0x10] sm:$0xff]  ;;  %v305_v26 = vld [vmem:[%s583_s5 + $0x18] sm:$0xff]  ;;  %p417_p0 = scmp.ne.s32.totalorder %s350_s24, %s416_s25  ;;  %p421_p1 = scmp.lt.s32.totalorder %s350_s24, %s350_s24 }
  0x11   :  { %82 = vperm.xlu0 %408, %v48_v17   ;;  %v414_v27 = vld [vmem:[%s581_s3] sm:$0xff]   ;;  %v415_v0 = vld [vmem:[%s581_s3 + $0x8] sm:$0xff]   ;;  %p422_p2 = scmp.lt.s32.totalorder %s420_s26, %s416_s25 }
  0x12   :  { %87 = vperm.xlu1 %409, %v49_v18   ;;  %401 = vmatprep.mubr.msk.bf16.mxu1 %vm242_vm2, %v414_v27 }
  0x13   :  { %p423_p3 = por %p422_p2, %p421_p1 }
  0x14   :  { %390 = vmatmul.mubr.msk.bf16.gmra.mrb[4].mxu0 %vm110_vm0, %v413_v16 }
  0x15   :  { %214 = vperm.xlu0 %408, %v208_v19   ;;  %p424_p4 = pnand %p423_p3, %p417_p0 }
  0x16   :  { %219 = vperm.xlu1 %409, %v209_v20  }
  0x19   :  { %224 = vperm.xlu0 %408, %v210_v21  }
  0x1a   :  { %229 = vperm.xlu1 %409, %v211_v22  }
  0x1d   :  { %308 = vperm.xlu0 %408, %v302_v23  }
  0x1e   :  { %313 = vperm.xlu1 %409, %v303_v24  }
  0x21   :  { %318 = vperm.xlu0 %408, %v304_v25  }
  0x22   :  { %323 = vperm.xlu1 %409, %v305_v26  }
  0x82   :  { %v63_v29 = vpop.permute.xlu1 %62 }
  0x83   :  { %v53_v28 = vpop.permute.xlu0 %52 }
  0x86   :  { %v68_v31 = vpop.permute.xlu1 %67 }
  0x87   :  { %v58_v30 = vpop.permute.xlu0 %57 }
  0x8c   :  { %v73_v35 = vpop.permute.xlu0 %72 }
  0x8d   :  { %v78_v40 = vpop.permute.xlu1 %77 }
  0x90   :  { %v83_v47 = vpop.permute.xlu0 %82 }
  0x91   :  { %v88_v52 = vpop.permute.xlu1 %87 }
  0x94   :  { %v215_v1 = vpop.permute.xlu0 %214 }
  0x95   :  { %v220_v2 = vpop.permute.xlu1 %219 }
  0x98   :  { %v225_v3 = vpop.permute.xlu0 %224 }
  0x99   :  { %v230_v4 = vpop.permute.xlu1 %229 }
  0x9c   :  { %v309_v10 = vpop.permute.xlu0 %308 }
  0x9d   :  { %v314_v15 = vpop.permute.xlu1 %313 }
  0xa0   :  { %v319_v21 = vpop.permute.xlu0 %318 }
  0xa1   :  { %v324_v24 = vpop.permute.xlu1 %323 }
  0xdf   :  { %v387_v32 = vpop.f32.mrb[0].mxu0 }
  0xe0   :  { %v170_v33 = vadd.f32 %v387_v32, %v63_v29  ;;  %v161_v34 = vpop.f32.mrb[1].mxu0 }
  0xe1   :  { %v162_v36 = vadd.f32 %v161_v34, %v53_v28  ;;  %v388_v37 = vpop.f32.mrb[2].mxu0 }
  0xe2   :  { %v173_v38 = vadd.f32 %v388_v37, %v68_v31  ;;  %v164_v39 = vpop.f32.mrb[3].mxu0  ;;  %v194_v42 = vmax.f32 %v170_v33, 0.0  ;;  %v340_v33 = vstv %s584_s6 }
  0xe3   :  { %v165_v41 = vadd.f32 %v164_v39, %v58_v30  ;;  %v192_v44 = vmax.f32 %v162_v36, 0.0 }
  0xe4   :  { %v195_v43 = vmax.f32 %v173_v38, 0.0 }
  0xe5   :  { %v193_v45 = vmax.f32 %v165_v41, 0.0 }
  0xe6   :  { %v205_v46 = vpack.c.bf16 %v195_v43, %v194_v42 }
  0xe7   :  { %v391_v48 = vpop.f32.mrb[4].mxu0  ;;  %v204_v49 = vpack.c.bf16 %v193_v45, %v192_v44 }
  0xe8   :  { %v186_v50 = vadd.f32 %v391_v48, %v83_v47  ;;  %v177_v51 = vpop.f32.mrb[5].mxu0 }
  0xe9   :  { %v178_v53 = vadd.f32 %v177_v51, %v73_v35  ;;  %v392_v54 = vpop.f32.mrb[6].mxu0  ;;  %393 = vmatprep.subr.bf16.mxu1 %v204_v49 }
  0xea   :  { %v189_v55 = vadd.f32 %v392_v54, %v88_v52  ;;  %v180_v56 = vpop.f32.mrb[7].mxu0  ;;  %394 = vmatpush3.bf16.msra.mxu1 %v204_v49  ;;  %v198_v58 = vmax.f32 %v186_v50, 0.0 }
  0xeb   :  { %v181_v57 = vadd.f32 %v180_v56, %v78_v40  ;;  %395 = vmatprep.subr.bf16.mxu1 %v205_v46  ;;  %v196_v60 = vmax.f32 %v178_v53, 0.0 }
  0xec   :  { %v199_v59 = vmax.f32 %v189_v55, 0.0 }
  0xed   :  { %v197_v61 = vmax.f32 %v181_v57, 0.0 }
  0xee   :  { %v207_v62 = vpack.c.bf16 %v199_v59, %v198_v58  ;;  %396 = vmatpush3.bf16.msra.mxu1 %v205_v46 }
  0xef   :  { %v206_v63 = vpack.c.bf16 %v197_v61, %v196_v60 }
  0xf1   :  { %397 = vmatprep.subr.bf16.mxu1 %v206_v63 }
  0xf2   :  { %398 = vmatpush3.bf16.msra.mxu1 %v206_v63 }
  0xf3   :  { %399 = vmatprep.subr.bf16.mxu1 %v207_v62 }
  0xf6   :  { %400 = vmatpush3.bf16.msra.mxu1 %v207_v62 }
  0xf9   :  { %402 = vmatmul.mubr.msk.bf16.vlgmr.msra.gmra.mrb[0].mxu1 %vm242_vm2, %v415_v0 }
 0x1cc   :  { %v403_v5 = vpop.f32.mrb[0].mxu1 }
 0x1cd   :  { %v283_v6 = vpop.f32.mrb[1].mxu1  ;;  %v292_v7 = vadd.f32 %v403_v5, %v225_v3 }
 0x1ce   :  { %v284_v8 = vadd.f32 %v283_v6, %v215_v1  ;;  %v404_v9 = vpop.f32.mrb[2].mxu1 }
 0x1cf   :  { %v286_v11 = vpop.f32.mrb[3].mxu1  ;;  %v295_v13 = vadd.f32 %v404_v9, %v230_v4  ;;  %v300_v16 = vmax.f32 %v292_v7, 0.0 }
 0x1d0   :  { %v298_v12 = vmax.f32 %v284_v8, 0.0  ;;  %v287_v14 = vadd.f32 %v286_v11, %v220_v2 }
 0x1d1   :  { %v301_v19 = vmax.f32 %v295_v13, 0.0  ;;  %v328_v22 = vmul.f32 %v319_v21, %v300_v16 }
 0x1d2   :  { %v299_v17 = vmax.f32 %v287_v14, 0.0  ;;  %v326_v18 = vmul.f32 %v309_v10, %v298_v12 }
 0x1d3   :  { %v329_v25 = vmul.f32 %v324_v24, %v301_v19 }
 0x1d4   :  { %v327_v20 = vmul.f32 %v314_v15, %v299_v17 }
 0x1d6   :  { %v330_v23 = vadd.f32 %v327_v20, %v326_v18 }
 0x1d8   :  { %v331_v26 = vadd.f32 %v330_v23, %v328_v22 }
 0x1da   :  { %v332_v27 = vadd.f32 %v331_v26, %v329_v25 }
 0x1dc   :  { %v333_v28 = vrot.slane %v332_v27, 4 }
 0x1de   :  { %v334_v29 = vadd.f32 %v333_v28, %v332_v27 }
 0x1e0   :  { %v335_v30 = vrot.slane %v334_v29, 2 }
 0x1e2   :  { %v336_v31 = vadd.f32 %v335_v30, %v334_v29 }
 0x1e4   :  { %v337_v32 = vrot.slane %v336_v31, 1 }
 0x1e6   :  { %v338_v34 = vadd.f32 %v337_v32, %v336_v31 }
 0x1e8   :  { %v341_v35 = vadd.f32 %v340_v33, %v338_v34 }
 0x1ea   :  { %342 = vst [vmem:[#allocation3] sm:$0x1] %v341_v35 }
 0x1eb   :  { %427 = shalt.err (!%p424_p4)
}
 0x1ec   :  { %s428_s29 = scalar_lea.hbm %s585_s7, 16 }
 0x1ed   :  { %p429_p5 = scmp.ne.s32.totalorder %s585_s7, %s428_s29  ;;  %p432_p6 = scmp.lt.u32.totalorder %s428_s29, %s585_s7 }
 0x1ef   :  { %p434_p7 = pnand %p432_p6, %p429_p5 }
 0x1f1   :  { %437 = shalt.err (!%p434_p7)
}
 0x1f2   :  { %352 = dma.vmem_to_hbm [thread:$0]  %s350_s24, 16, %s585_s7, [#allocation4]  }
 0x1f3   :  { %438 = dma.done.wait [#allocation4], 16  }
 0x1f4   :  { %439 = vsyncadd [#allocation4], 4294967280 }
 0x1f5   :  { %356 = vsyncpa [#allocation4], 1 }

</bundles_post_ra>
